<compile_context>
chip_gen: v7x
topology: tpu7x:2x2x1
jax: 0.10.0
libtpu: 0.0.40
codegen_flags: <defaults>
</compile_context>

<pallas_src>
import functools

import jax
import jax.numpy as jnp
from jax import lax
from jax.experimental import pallas as pl
from jax.experimental.pallas import tpu as pltpu


def _mlp_kernel(x_ref, w1_ref, w2_ref, o_ref, *, compute_dtype):
    """One batch tile: o = sigmoid(relu(x @ W1.T) @ W2.T).

    x_ref : (TB, num_in)           input dtype (f32); cast to compute dtype in-kernel
    w1_ref: (num_hidden, num_in)   compute dtype, VMEM-resident across the grid
    w2_ref: (num_out, num_hidden)  compute dtype, VMEM-resident across the grid
    o_ref : (TB, num_out)          float32, unpadded (masked store, tiny HBM writeback)
    """
    # Cast inside the kernel: avoids materializing a second copy of x in HBM.
    x = x_ref[...].astype(compute_dtype)
    # lin1: contract the last dims of both operands (== x @ W1.T); f32 MXU accumulation.
    h = lax.dot_general(
        x, w1_ref[...],
        dimension_numbers=(((1,), (1,)), ((), ())),
        preferred_element_type=jnp.float32,
    )
    # relu in f32 on the accumulator.
    h = jnp.maximum(h, 0.0)
    # lin2: recast activations to the weight dtype for the MXU; keep f32 accumulation.
    z = lax.dot_general(
        h.astype(w2_ref.dtype), w2_ref[...],
        dimension_numbers=(((1,), (1,)), ((), ())),
        preferred_element_type=jnp.float32,
    )
    # sigmoid in f32 (EUP exp); store only the real num_out columns.
    o_ref[...] = jax.nn.sigmoid(z).astype(o_ref.dtype)


def _round_up(x, m):
    return ((x + m - 1) // m) * m


@functools.partial(jax.jit, static_argnames=("block_b", "compute_dtype"))
def sigmoid_deeplift_forward(x, w1, w2, *, block_b=4096, compute_dtype=jnp.bfloat16):
    """x: (B, num_in); w1: (num_hidden, num_in); w2: (num_out, num_hidden).

    Matches PyTorch nn.Linear(bias=False) semantics: y = sigmoid(relu(x @ W1.T) @ W2.T).
    Use compute_dtype=jnp.float32 for bit-closer parity with the f32 PyTorch reference.
    """
    B, num_in = x.shape
    num_hidden, num_in_w = w1.shape
    num_out, num_hidden_w = w2.shape
    assert num_in_w == num_in and num_hidden_w == num_hidden

    # ---- Batch tiling: no x pad / cast copies in HBM --------------------------------
    # Sublane-aligned batch tile, capped at block_b.
    tb = _round_up(min(block_b, _round_up(B, 8)), 8)
    # v7x megacore: keep >= 2 grid steps whenever the batch is big enough to split.
    if pl.cdiv(B, tb) < 2 and B > 8:
        tb = _round_up(pl.cdiv(B, 2), 8)
    grid = (pl.cdiv(B, tb),)

    # Weights are tiny; the one-time cast to the MXU compute dtype stays in the wrapper.
    w1c = w1.astype(compute_dtype)
    w2c = w2.astype(compute_dtype)

    cost = pl.CostEstimate(
        flops=2 * B * (num_in * num_hidden + num_hidden * num_out),
        transcendentals=B * num_out,
        bytes_accessed=(x.size * x.dtype.itemsize
                        + (w1c.size + w2c.size) * jnp.dtype(compute_dtype).itemsize
                        + B * num_out * 4),
    )

    kernel = functools.partial(_mlp_kernel, compute_dtype=compute_dtype)
    return pl.pallas_call(
        kernel,
        out_shape=jax.ShapeDtypeStruct((B, num_out), jnp.float32),
        grid_spec=pl.GridSpec(
            grid=grid,
            in_specs=[
                # x: streamed per batch tile in its original dtype (cast in-kernel).
                pl.BlockSpec((tb, num_in), lambda i: (i, 0)),
                # Weights: same block every step -> VMEM-resident, DMA'd from HBM once.
                pl.BlockSpec((num_hidden, num_in), lambda i: (0, 0)),
                pl.BlockSpec((num_out, num_hidden), lambda i: (0, 0)),
            ],
            # Unpadded output: last dim equals the full array dim (legal). Masked vst
            # in VMEM, but the HBM writeback is a single contiguous num_out*4 B/row.
            out_specs=pl.BlockSpec((tb, num_out), lambda i: (i, 0)),
        ),
        compiler_params=pltpu.CompilerParams(
            # Batch tiles are independent -> shard grid steps across TensorCores on v7x.
            dimension_semantics=("parallel",),
        ),
        cost_estimate=cost,
    )(x, w1c, w2c)


if __name__ == "__main__":
    # Small shapes consistent with the module: num_in=32, num_hidden=64, num_out=8.
    num_in, num_hidden, num_out = 32, 64, 8
    batch = 2

    key = jax.random.PRNGKey(0)
    x = jax.random.normal(key, (batch, num_in), dtype=jnp.float32)

    # Deterministic parameters exactly as in SigmoidDeepLiftModel.__init__: all-ones.
    w1 = jnp.ones((num_hidden, num_in), dtype=jnp.float32)   # lin1.weight
    w2 = jnp.ones((num_out, num_hidden), dtype=jnp.float32)  # lin2.weight

    out = sigmoid_deeplift_forward(x, w1, w2)
    out = jax.block_until_ready(out)
    assert out.shape == (batch, num_out)
    assert bool(jnp.all((out >= 0.0) & (out <= 1.0)))

    # Reference mirroring the kernel's precision choices (bf16 operands, f32
    # accumulation, bf16 recast of the hidden activations) -> tight tolerance.
    xb = x.astype(jnp.bfloat16).astype(jnp.float32)
    w1b = w1.astype(jnp.bfloat16).astype(jnp.float32)
    w2b = w2.astype(jnp.bfloat16).astype(jnp.float32)
    h_ref = jnp.maximum(xb @ w1b.T, 0.0)
    ref = jax.nn.sigmoid(h_ref.astype(jnp.bfloat16).astype(jnp.float32) @ w2b.T)
    assert jnp.allclose(out, ref, atol=2e-3, rtol=2e-3)

    print("KERNEL_OK")
</pallas_src>

<mosaic_0001>
module attributes {stable_mosaic.version = 11 : i64} {
  func.func @_mlp_kernel(%arg0: i32, %arg1: memref<8x32xf32, #tpu.memory_space<vmem>>, %arg2: memref<64x32xbf16, #tpu.memory_space<vmem>>, %arg3: memref<8x64xbf16, #tpu.memory_space<vmem>>, %arg4: memref<8x8xf32, #tpu.memory_space<vmem>>) attributes {dimension_semantics = [#tpu.dimension_semantics<parallel>], iteration_bounds = array<i64: 1>, scalar_prefetch = 0 : i64, scratch_operands = 0 : i64, tpu.core_type = #tpu.core_type<tc>, window_params = [{transform_indices = @transform_0, window_bounds = array<i64: 8, 32>}, {pipeline_mode = #tpu.pipeline_mode<synchronous>, transform_indices = @transform_1, window_bounds = array<i64: 64, 32>}, {pipeline_mode = #tpu.pipeline_mode<synchronous>, transform_indices = @transform_2, window_bounds = array<i64: 8, 64>}, {transform_indices = @transform_3, window_bounds = array<i64: 8, 8>}]} {
    %c0 = arith.constant 0 : index
    %c0_0 = arith.constant 0 : index
    %0 = vector.load %arg1[%c0, %c0_0] : memref<8x32xf32, #tpu.memory_space<vmem>>, vector<8x32xf32>
    %1 = arith.truncf %0 : vector<8x32xf32> to vector<8x32xbf16>
    %c0_1 = arith.constant 0 : index
    %c0_2 = arith.constant 0 : index
    %2 = vector.load %arg2[%c0_1, %c0_2] : memref<64x32xbf16, #tpu.memory_space<vmem>>, vector<64x32xbf16>
    %cst = arith.constant dense<0.000000e+00> : vector<8x64xf32>
    %3 = tpu.matmul %1, %2, %cst {dimension_numbers = #tpu.dot_dimension_numbers<[1], [1], [0], [0], [0, 0, 1, 0], [], []>} : vector<8x32xbf16>, vector<64x32xbf16>, vector<8x64xf32> -> vector<8x64xf32>
    %cst_3 = arith.constant 0.000000e+00 : f32
    %4 = vector.broadcast %cst_3 : f32 to vector<8x64xf32>
    %5 = arith.maximumf %3, %4 : vector<8x64xf32>
    %6 = arith.truncf %5 : vector<8x64xf32> to vector<8x64xbf16>
    %c0_4 = arith.constant 0 : index
    %c0_5 = arith.constant 0 : index
    %7 = vector.load %arg3[%c0_4, %c0_5] : memref<8x64xbf16, #tpu.memory_space<vmem>>, vector<8x64xbf16>
    %cst_6 = arith.constant dense<0.000000e+00> : vector<8x8xf32>
    %8 = tpu.matmul %6, %7, %cst_6 {dimension_numbers = #tpu.dot_dimension_numbers<[1], [1], [0], [0], [0, 0, 1, 0], [], []>} : vector<8x64xbf16>, vector<8x64xbf16>, vector<8x8xf32> -> vector<8x8xf32>
    %9 = arith.negf %8 : vector<8x8xf32>
    %10 = math.exp %9 : vector<8x8xf32>
    %cst_7 = arith.constant 1.000000e+00 : f32
    %11 = vector.broadcast %cst_7 : f32 to vector<8x8xf32>
    %12 = arith.addf %11, %10 : vector<8x8xf32>
    %13 = arith.divf %11, %12 : vector<8x8xf32>
    %c0_8 = arith.constant 0 : index
    %c0_9 = arith.constant 0 : index
    %14 = vector.load %arg4[%c0_8, %c0_9] : memref<8x8xf32, #tpu.memory_space<vmem>>, vector<8x8xf32>
    tpu.vector_store %arg4[%c0_8, %c0_9], %13 {strides = array<i32>} : memref<8x8xf32, #tpu.memory_space<vmem>>, vector<8x8xf32>,
    return
  }
  func.func @transform_0(%arg0: i32) -> (i32, i32) {
    %c0_i32 = arith.constant 0 : i32
    %c0_i32_0 = arith.constant 0 : i32
    return %arg0, %c0_i32 : i32, i32
  }
  func.func @transform_1(%arg0: i32) -> (i32, i32) {
    %c0_i32 = arith.constant 0 : i32
    %c0_i32_0 = arith.constant 0 : i32
    %c0_i32_1 = arith.constant 0 : i32
    return %c0_i32, %c0_i32_0 : i32, i32
  }
  func.func @transform_2(%arg0: i32) -> (i32, i32) {
    %c0_i32 = arith.constant 0 : i32
    %c0_i32_0 = arith.constant 0 : i32
    %c0_i32_1 = arith.constant 0 : i32
    return %c0_i32, %c0_i32_0 : i32, i32
  }
  func.func @transform_3(%arg0: i32) -> (i32, i32) {
    %c0_i32 = arith.constant 0 : i32
    %c0_i32_0 = arith.constant 0 : i32
    return %arg0, %c0_i32 : i32, i32
  }
}

</mosaic_0001>

<bundles_post_ra>
// kernel: sigmoid_deeplift_forward.1
= control target key start
LH: loop header
LB: loop body
LE: loop exit
PB: predicated region body
PF: predicated region fallthrough
CT: control target
= control target key end

     0   :  { %8 = vsyncpa [#allocation3], 0  ;;  %v245_v1 = vmov 0.0   ;;  %vm46_vm0 = vcmask 261120   ;;  %vm105_vm1 = vcmask 523264   ;;  %vm246_vm2 = vmmov 0   ;;  %s307_s0 = inlined_call_operand.vmem [shape: f32[2,32], index: 0, kind: input, shape index: {}]   ;;  %s308_s1 = inlined_call_operand.vmem [shape: bf16[64,32], index: 1, kind: input, shape index: {}]   ;;  %s309_s2 = inlined_call_operand.vmem [shape: bf16[8,64], index: 2, kind: input, shape index: {}]   ;;  %s310_s3 = inlined_call_operand.hbm [shape: f32[2,8], index: 3, kind: output, shape index: {}]  }
   0x1   :  { %v213_v0 = vld [vmem:[%s308_s1] sm:$0xff]   ;;  %190 = vmatprep.subr.bf16.mxu0 %v245_v1  ;;  %202 = vmatprep.subr.bf16.mxu1 %v245_v1  ;;  %v214_v3 = vld [vmem:[%s308_s1 + $0x8] sm:$0xff]   ;;  %v215_v7 = vld [vmem:[%s308_s1 + $0x10] sm:$0xff]   ;;  %vm158_vm3 = vcmask 64512  }
   0x2   :  { %v51_v2 = vsel %vm46_vm0, %v213_v0, 0  ;;  %198 = vmatprep.mubr.msk.bf16.mxu0 %vm246_vm2, %v245_v1  ;;  %v104_v4 = vld [vmem:[%s309_s2] sm:$0xf]  ;;  %204 = vmatprep.mubr.msk.bf16.mxu1 %vm246_vm2, %v245_v1  ;;  %v54_v6 = vsel %vm46_vm0, %v214_v3, 0  ;;  %v57_v8 = vsel %vm46_vm0, %v215_v7, 0  ;;  %v216_v9 = vld [vmem:[%s308_s1 + $0x18] sm:$0xff]  }
   0x3   :  { %191 = vmatpush3.bf16.xpose.msra.mxu0 %v51_v2  ;;  %v110_v5 = vsel %vm105_vm1, %v104_v4, 0  ;;  %v60_v10 = vsel %vm46_vm0, %v216_v9, 0  ;;  %v16_v11 = vld [vmem:[%s307_s0] sm:$0xff] }
   0x4   :  { %192 = vmatprep.subr.bf16.mxu0 %v245_v1  ;;  %203 = vmatpush3.bf16.xpose.msra.mxu1 %v110_v5  ;;  %v17_v12 = vpack.c.bf16 %v16_v11, %v16_v11 }
   0xb   :  { %193 = vmatpush3.bf16.xpose.msra.mxu0 %v54_v6 }
   0xc   :  { %194 = vmatprep.subr.bf16.mxu0 %v245_v1 }
  0x13   :  { %195 = vmatpush3.bf16.xpose.msra.mxu0 %v57_v8 }
  0x14   :  { %196 = vmatprep.subr.bf16.mxu0 %v245_v1 }
  0x1b   :  { %197 = vmatpush3.bf16.xpose.msra.mxu0 %v60_v10 }
  0x22   :  { %199 = vmatmul.mubr.msk.bf16.vlgmr.msra.gmra.mrb[0].mxu0 %vm46_vm0, %v17_v12 }
  0xf5   :  { %v96_v13 = vpop.f32.mrb[0].mxu0 }
  0xf6   :  { %v102_v14 = vmax.f32 %v96_v13, 0.0  ;;  %v200_v15 = vpop.f32.mrb[1].mxu0 }
  0xf7   :  { %v99_v16 = vpop.f32.mrb[2].mxu0 }
  0xf8   :  { %v103_v17 = vpack.c.bf16 %v102_v14, %v102_v14  ;;  %v201_v18 = vpop.f32.mrb[3].mxu0 }
  0xfa   :  { %205 = vmatmul.mubr.msk.bf16.vlgmr.msra.gmra.mrb[0].mxu1 %vm105_vm1, %v103_v17 }
 0x1cd   :  { %v146_v19 = vpop.f32.mrb[0].mxu1 }
 0x1ce   :  { %v182_v20 = vmul.f32 -1.442695, %v146_v19  ;;  %v206_v21 = vpop.f32.mrb[1].mxu1 }
 0x1cf   :  { %v149_v22 = vpop.f32.mrb[2].mxu1 }
 0x1d0   :  { %217 = vpow2.f32 %v182_v20  ;;  %v207_v23 = vpop.f32.mrb[3].mxu1 }
 0x1da   :  { %v218_v24 = vpop.eup %217 }
 0x1db   :  { %v155_v25 = vadd.f32 1.0, %v218_v24 }
 0x1dd   :  { %219 = vrcp.f32 %v155_v25 }
 0x1e7   :  { %v220_v26 = vpop.eup %219 }
 0x1e8   :  { %159 = vst.msk [vmem:[#allocation2] sm:$0xff] %vm158_vm3, %v220_v26 }
 0x1e9   :  { %164 = vsyncadd [#allocation3], 96  ;;  %s247_s0 = smov [#allocation2]  }
 0x1ea   :  { %s165_s1 = sshll.u32 %s247_s0, 4  ;;  %s166_s1 = int_to_ptr.vmem [resolvable:$true] %s165_s1 }
 0x1eb   :  { %s221_s23 = scalar_lea.vmem %s166_s1, 32  ;;  %s225_s24 = scalar_lea.vmem %s166_s1, 128 }
 0x1ec   :  { %p222_p0 = scmp.ne.s32.totalorder %s166_s1, %s221_s23  ;;  %p226_p1 = scmp.lt.s32.totalorder %s166_s1, %s166_s1 }
 0x1ed   :  { %p227_p2 = scmp.lt.s32.totalorder %s225_s24, %s221_s23 }
 0x1ef   :  { %p228_p3 = por %p227_p2, %p226_p1 }
 0x1f1   :  { %p229_p4 = pnand %p228_p3, %p222_p0 }
 0x1f3   :  { %232 = shalt.err (!%p229_p4)
}
 0x1f4   :  { %s233_s27 = scalar_lea.hbm %s310_s3, 32 }
 0x1f5   :  { %p234_p5 = scmp.ne.s32.totalorder %s310_s3, %s233_s27  ;;  %p237_p6 = scmp.lt.u32.totalorder %s233_s27, %s310_s3 }
 0x1f7   :  { %p239_p7 = pnand %p237_p6, %p234_p5 }
 0x1f9   :  { %242 = shalt.err (!%p239_p7)
}
 0x1fa   :  { %s248_s5 = smov 32   ;;  %s249_s6 = smov 2  }
 0x1fb   :  { %171 = dma.vmem_to_hbm [thread:$0]  %s166_s1, 32, %s310_s3, [#allocation3], %s248_s5, %s248_s5, %s249_s6  }
 0x1fc   :  { %243 = dma.done.wait [#allocation3], 128  }
 0x1fd   :  { %244 = vsyncadd [#allocation3], 4294967168 }
 0x1fe   :  { %175 = vsyncpa [#allocation3], 1 }

</bundles_post_ra>
